<compile_context>
chip_gen: v7x
topology: tpu7x:2x2x1
jax: 0.10.0
libtpu: 0.0.40
codegen_flags: <defaults>
</compile_context>

<pallas_src>
import functools

import jax
import jax.numpy as jnp
from jax.experimental import pallas as pl
from jax.experimental.pallas import tpu as pltpu

LANE = 128
SUBLANE = 8


def _round_up(v, m):
    return ((v + m - 1) // m) * m


def _vmem_budget_bytes():
    """Usable VMEM budget with headroom: ~48 MiB on v7x, ~96 MiB on v5e/v6e."""
    try:
        cap = int(pltpu.get_tpu_info().vmem_capacity_bytes)
    except Exception:  # pragma: no cover - conservative fallback
        cap = 64 << 20
    return (cap * 3) // 4


# --------------------------------------------------------------------------
# Kernels
# --------------------------------------------------------------------------

def _bn_fused_kernel(x_ref, p_ref, y_ref, stats_ref, *, eps, momentum, n_rows):
    """Training BatchNorm1d on a full-N column slab of features.

    p_ref rows: 0=weight(gamma), 1=bias(beta), 2=running_mean, 3=running_var.
    stats_ref rows: 0=new running_mean, 1=new running_var.

    NOTE: when C is not a multiple of 128, the lanes past C in the last block
    hold undefined data and may become inf/NaN; their stores are masked by
    Pallas so this is benign. Do NOT "fix" it with an HBM padding pass.
    """
    x = x_ref[...].astype(jnp.float32)
    inv_n = 1.0 / n_rows

    # Centered variance (mean first) for numerical stability; x is already
    # VMEM-resident so this only costs extra VPU work, no extra HBM traffic.
    mean = jnp.sum(x, axis=0, keepdims=True) * inv_n
    xc = x - mean
    var = jnp.sum(xc * xc, axis=0, keepdims=True) * inv_n     # biased

    gamma = p_ref[0:1, :]
    beta = p_ref[1:2, :]
    inv_std = jax.lax.rsqrt(var + eps)                          # EUP slot, ~free
    y_ref[...] = (xc * (inv_std * gamma) + beta).astype(y_ref.dtype)

    # Running stats (PyTorch uses the *unbiased* batch variance here).
    unbias = n_rows / (n_rows - 1.0)
    stats_ref[0:1, :] = (1.0 - momentum) * p_ref[2:3, :] + momentum * mean
    stats_ref[1:2, :] = (1.0 - momentum) * p_ref[3:4, :] + momentum * (var * unbias)


def _bn_sums_kernel(x_ref, sums_ref, *, n_rows, block_n):
    """Pass 1 of the N-tiled variant: accumulate per-feature sum / sum-of-squares.

    Grid = (c_blocks, n_blocks); the N axis is the (resident-accumulator)
    reduction axis. Rows past N in the ragged last block are masked to zero so
    they do not pollute the reduction.
    """
    k = pl.program_id(1)

    @pl.when(k == 0)
    def _():
        sums_ref[...] = jnp.zeros_like(sums_ref)

    x = x_ref[...].astype(jnp.float32)
    row = jax.lax.broadcasted_iota(jnp.int32, x.shape, 0)
    x = jnp.where(row < (n_rows - k * block_n), x, 0.0)
    sums_ref[0:1, :] += jnp.sum(x, axis=0, keepdims=True)
    sums_ref[1:2, :] += jnp.sum(x * x, axis=0, keepdims=True)


def _bn_apply_kernel(x_ref, ss_ref, y_ref):
    """Pass 2 of the N-tiled variant: y = x*scale + shift (elementwise)."""
    x = x_ref[...].astype(jnp.float32)
    y_ref[...] = (x * ss_ref[0:1, :] + ss_ref[1:2, :]).astype(y_ref.dtype)


# --------------------------------------------------------------------------
# Wrapper
# --------------------------------------------------------------------------

def meta_batchnorm1d_forward(x, weight, bias, running_mean, running_var, *,
                             momentum=0.1, eps=1e-5,
                             block_c=None, block_n=None,
                             nogrid_limit_bytes=None):
    """Training-mode BatchNorm1d on x: [N, C].

    Returns (y, new_running_mean, new_running_var).
    block_c / block_n / nogrid_limit_bytes are optional overrides (testing);
    by default tiles are derived from N, C, dtype and the chip's VMEM budget.
    """
    n, c = x.shape
    if n < 2:
        # PyTorch raises for batch size 1 in training mode.
        raise ValueError("MetaBatchNorm1d training mode needs batch size > 1")

    momentum = float(momentum)
    eps = float(eps)
    itemsize = jnp.dtype(x.dtype).itemsize
    c128 = _round_up(c, LANE)
    budget = _vmem_budget_bytes()

    # Pack the four per-feature vectors into a single [4, C] f32 slab (one DMA).
    params = jnp.stack([weight, bias, running_mean, running_var], axis=0)
    params = params.astype(jnp.float32)

    # ---------------- path selection ----------------
    # C-tiled path: per feature column we pay the double-buffered in/out blocks
    # plus the in-kernel f32 temporaries (x, x-mean, (x-mean)^2).
    per_col = n * (4 * itemsize + 12)
    if block_c is None:
        bc = min((budget // per_col) // LANE * LANE, c128)
    else:
        bc = min(max(LANE, (int(block_c) // LANE) * LANE), c128)

    # N-tiled two-pass path: needed when even a single 128-lane-wide full-N
    # column slab does not fit (or when forced for testing via block_n).
    use_ngrid = (block_n is not None and int(block_n) < n) or bc < LANE

    # No-grid path: only for genuinely small problems (everything resident,
    # zero pipeline scaffolding). Gate on total resident bytes, including N.
    nogrid_limit = (8 << 20) if nogrid_limit_bytes is None else int(nogrid_limit_bytes)
    nogrid_bytes = 2 * n * c * itemsize + 3 * n * c * 4 + 8 * c * 4
    use_nogrid = (not use_ngrid) and nogrid_bytes <= min(nogrid_limit, budget)

    fused_cost = pl.CostEstimate(
        flops=int(9 * n * c),
        transcendentals=int(c),
        bytes_accessed=int(2 * n * c * itemsize + 8 * c * 4))

    if not use_ngrid:
        kern = functools.partial(_bn_fused_kernel, eps=eps, momentum=momentum,
                                 n_rows=float(n))
        out_shape = (jax.ShapeDtypeStruct((n, c), x.dtype),
                     jax.ShapeDtypeStruct((2, c), jnp.float32))

        if use_nogrid:
            vmem = pl.BlockSpec(memory_space=pltpu.MemorySpace.VMEM)
            y, stats = pl.pallas_call(
                kern,
                out_shape=out_shape,
                in_specs=[vmem, vmem],
                out_specs=(vmem, vmem),
                compiler_params=pltpu.CompilerParams(
                    vmem_limit_bytes=int(budget)),
                cost_estimate=fused_cost,
            )(x, params)
        else:
            # Feature-tiled grid: blocks are independent ("parallel") and
            # BlockSpec double-buffering overlaps HBM traffic with VPU work.
            gc = pl.cdiv(c, bc)
            y, stats = pl.pallas_call(
                kern,
                out_shape=out_shape,
                grid=(gc,),
                in_specs=[pl.BlockSpec((n, bc), lambda j: (0, j)),
                          pl.BlockSpec((4, bc), lambda j: (0, j))],
                out_specs=(pl.BlockSpec((n, bc), lambda j: (0, j)),
                           pl.BlockSpec((2, bc), lambda j: (0, j))),
                compiler_params=pltpu.CompilerParams(
                    dimension_semantics=("parallel",),
                    vmem_limit_bytes=int(budget)),
                cost_estimate=fused_cost,
            )(x, params)

        new_rm, new_rv = stats[0], stats[1]

    else:
        # ---------------- N-tiled two-pass variant ----------------
        if block_c is None:
            bc2 = min(c128, 512)
        else:
            bc2 = min(max(LANE, (int(block_c) // LANE) * LANE), c128)
        per_row = bc2 * (4 * itemsize + 8)
        if block_n is None:
            bn = max(SUBLANE, (budget // per_row) // SUBLANE * SUBLANE)
        else:
            bn = max(SUBLANE, (int(block_n) // SUBLANE) * SUBLANE)
        bn = min(bn, _round_up(n, SUBLANE))

        gc = pl.cdiv(c, bc2)
        gn = pl.cdiv(n, bn)

        # Pass 1: per-feature sum and sum-of-squares (reduction axis last).
        sums = pl.pallas_call(
            functools.partial(_bn_sums_kernel, n_rows=n, block_n=bn),
            out_shape=jax.ShapeDtypeStruct((2, c), jnp.float32),
            grid=(gc, gn),
            in_specs=[pl.BlockSpec((bn, bc2), lambda j, k: (k, j))],
            out_specs=pl.BlockSpec((2, bc2), lambda j, k: (0, j)),
            compiler_params=pltpu.CompilerParams(
                dimension_semantics=("parallel", "arbitrary"),
                vmem_limit_bytes=int(budget)),
            cost_estimate=pl.CostEstimate(
                flops=int(3 * n * c), transcendentals=0,
                bytes_accessed=int(n * c * itemsize + 2 * c * 4)),
        )(x)

        # Tiny per-feature math (C elements) stays in plain JAX.
        inv_n = 1.0 / n
        mean = sums[0] * inv_n
        var = jnp.maximum(sums[1] * inv_n - mean * mean, 0.0)
        inv_std = jax.lax.rsqrt(var + eps)
        scale = params[0] * inv_std
        shift = params[1] - mean * scale
        new_rm = (1.0 - momentum) * params[2] + momentum * mean
        new_rv = (1.0 - momentum) * params[3] + momentum * (var * (n / (n - 1.0)))
        ss = jnp.stack([scale, shift], axis=0)

        # Pass 2: elementwise normalize.
        y = pl.pallas_call(
            _bn_apply_kernel,
            out_shape=jax.ShapeDtypeStruct((n, c), x.dtype),
            grid=(gn, gc),
            in_specs=[pl.BlockSpec((bn, bc2), lambda i, j: (i, j)),
                      pl.BlockSpec((2, bc2), lambda i, j: (0, j))],
            out_specs=pl.BlockSpec((bn, bc2), lambda i, j: (i, j)),
            compiler_params=pltpu.CompilerParams(
                dimension_semantics=("parallel", "parallel"),
                vmem_limit_bytes=int(budget)),
            cost_estimate=pl.CostEstimate(
                flops=int(2 * n * c), transcendentals=0,
                bytes_accessed=int(2 * n * c * itemsize + 2 * c * 4)),
        )(x, ss)

    return (y,
            new_rm.astype(running_mean.dtype),
            new_rv.astype(running_var.dtype))


# --------------------------------------------------------------------------
# Reference + self-test
# --------------------------------------------------------------------------

def _reference_bn(x, weight, bias, running_mean, running_var, momentum, eps):
    """Plain-JAX reference mirroring PyTorch F.batch_norm in training mode."""
    n = x.shape[0]
    mean = x.mean(axis=0)
    var = ((x - mean) ** 2).mean(axis=0)                        # biased
    y = (x - mean) / jnp.sqrt(var + eps) * weight + bias
    new_rm = (1 - momentum) * running_mean + momentum * mean
    new_rv = (1 - momentum) * running_var + momentum * (var * n / (n - 1))
    return y, new_rm, new_rv


if __name__ == "__main__":
    key = jax.random.PRNGKey(0)
    momentum, eps = 0.1, 1e-5

    # (n, c, overrides): exercises
    #   - no-grid path, ragged C (no HBM pad, masked lanes)
    #   - no-grid path, lane-dense C
    #   - forced C-tiled grid with a ragged last feature block
    #   - forced N-tiled two-pass path with ragged N and C blocks
    cases = [
        (32, 64, {}),
        (16, 256, {}),
        (32, 300, dict(nogrid_limit_bytes=0, block_c=128)),
        (52, 200, dict(nogrid_limit_bytes=0, block_c=128, block_n=16)),
    ]

    for idx, (n, c, overrides) in enumerate(cases):
        k = jax.random.fold_in(key, idx)
        kx, kg, kb, km, kv = jax.random.split(k, 5)
        x = 1.5 * jax.random.normal(kx, (n, c), jnp.float32) + 0.3
        weight = 1.0 + 0.1 * jax.random.normal(kg, (c,), jnp.float32)
        bias = 0.1 * jax.random.normal(kb, (c,), jnp.float32)
        running_mean = 0.05 * jax.random.normal(km, (c,), jnp.float32)
        running_var = 1.0 + 0.1 * jax.random.uniform(kv, (c,), jnp.float32)

        fwd = jax.jit(functools.partial(
            meta_batchnorm1d_forward, momentum=momentum, eps=eps, **overrides))
        y, nrm, nrv = jax.block_until_ready(
            fwd(x, weight, bias, running_mean, running_var))

        y_ref, rm_ref, rv_ref = _reference_bn(
            x, weight, bias, running_mean, running_var, momentum, eps)

        assert y.shape == (n, c)
        assert jnp.allclose(y, y_ref, atol=1e-4, rtol=1e-4), f"y mismatch (case {idx})"
        assert jnp.allclose(nrm, rm_ref, atol=1e-5, rtol=1e-5), f"running_mean mismatch (case {idx})"
        assert jnp.allclose(nrv, rv_ref, atol=1e-4, rtol=1e-4), f"running_var mismatch (case {idx})"

    print("KERNEL_OK")
</pallas_src>

<mosaic_0001>
module attributes {stable_mosaic.version = 11 : i64} {
  func.func @_bn_fused_kernel(%arg0: memref<32x64xf32, #tpu.memory_space<vmem>>, %arg1: memref<4x64xf32, #tpu.memory_space<vmem>>, %arg2: memref<32x64xf32, #tpu.memory_space<vmem>>, %arg3: memref<2x64xf32, #tpu.memory_space<vmem>>) attributes {dimension_semantics = [], scalar_prefetch = 0 : i64, scratch_operands = 0 : i64, tpu.core_type = #tpu.core_type<tc>} {
    %c0 = arith.constant 0 : index
    %c0_0 = arith.constant 0 : index
    %0 = vector.load %arg0[%c0, %c0_0] : memref<32x64xf32, #tpu.memory_space<vmem>>, vector<32x64xf32>
    %cst = arith.constant dense<0.000000e+00> : vector<64xf32>
    %1 = vector.multi_reduction <add>, %0, %cst [0] : vector<32x64xf32> to vector<64xf32>
    %2 = vector.shape_cast %1 : vector<64xf32> to vector<1x64xf32>
    %cst_1 = arith.constant 3.125000e-02 : f32
    %3 = vector.broadcast %cst_1 : f32 to vector<1x64xf32>
    %4 = arith.mulf %2, %3 : vector<1x64xf32>
    %5 = vector.broadcast %4 : vector<1x64xf32> to vector<32x64xf32>
    %6 = arith.subf %0, %5 : vector<32x64xf32>
    %7 = arith.mulf %6, %6 : vector<32x64xf32>
    %cst_2 = arith.constant dense<0.000000e+00> : vector<64xf32>
    %8 = vector.multi_reduction <add>, %7, %cst_2 [0] : vector<32x64xf32> to vector<64xf32>
    %9 = vector.shape_cast %8 : vector<64xf32> to vector<1x64xf32>
    %cst_3 = arith.constant 3.125000e-02 : f32
    %10 = vector.broadcast %cst_3 : f32 to vector<1x64xf32>
    %11 = arith.mulf %9, %10 : vector<1x64xf32>
    %c0_4 = arith.constant 0 : index
    %c0_5 = arith.constant 0 : index
    %12 = vector.load %arg1[%c0_4, %c0_5] : memref<4x64xf32, #tpu.memory_space<vmem>>, vector<1x64xf32>
    %c1 = arith.constant 1 : index
    %c0_6 = arith.constant 0 : index
    %13 = vector.load %arg1[%c1, %c0_6] : memref<4x64xf32, #tpu.memory_space<vmem>>, vector<1x64xf32>
    %cst_7 = arith.constant 9.99999974E-6 : f32
    %14 = vector.broadcast %cst_7 : f32 to vector<1x64xf32>
    %15 = arith.addf %11, %14 : vector<1x64xf32>
    %16 = math.rsqrt %15 : vector<1x64xf32>
    %17 = arith.mulf %16, %12 : vector<1x64xf32>
    %18 = vector.broadcast %17 : vector<1x64xf32> to vector<32x64xf32>
    %19 = arith.mulf %6, %18 : vector<32x64xf32>
    %20 = vector.broadcast %13 : vector<1x64xf32> to vector<32x64xf32>
    %21 = arith.addf %19, %20 : vector<32x64xf32>
    %c0_8 = arith.constant 0 : index
    %c0_9 = arith.constant 0 : index
    %22 = vector.load %arg2[%c0_8, %c0_9] : memref<32x64xf32, #tpu.memory_space<vmem>>, vector<32x64xf32>
    tpu.vector_store %arg2[%c0_8, %c0_9], %21 {strides = array<i32>} : memref<32x64xf32, #tpu.memory_space<vmem>>, vector<32x64xf32>,
    %c2 = arith.constant 2 : index
    %c0_10 = arith.constant 0 : index
    %23 = vector.load %arg1[%c2, %c0_10] : memref<4x64xf32, #tpu.memory_space<vmem>>, vector<1x64xf32>
    %cst_11 = arith.constant 0.899999976 : f32
    %24 = vector.broadcast %cst_11 : f32 to vector<1x64xf32>
    %25 = arith.mulf %24, %23 : vector<1x64xf32>
    %cst_12 = arith.constant 1.000000e-01 : f32
    %26 = vector.broadcast %cst_12 : f32 to vector<1x64xf32>
    %27 = arith.mulf %26, %4 : vector<1x64xf32>
    %28 = arith.addf %25, %27 : vector<1x64xf32>
    %c0_13 = arith.constant 0 : index
    %c0_14 = arith.constant 0 : index
    %29 = vector.load %arg3[%c0_13, %c0_14] : memref<2x64xf32, #tpu.memory_space<vmem>>, vector<1x64xf32>
    tpu.vector_store %arg3[%c0_13, %c0_14], %28 {strides = array<i32>} : memref<2x64xf32, #tpu.memory_space<vmem>>, vector<1x64xf32>,
    %c3 = arith.constant 3 : index
    %c0_15 = arith.constant 0 : index
    %30 = vector.load %arg1[%c3, %c0_15] : memref<4x64xf32, #tpu.memory_space<vmem>>, vector<1x64xf32>
    %cst_16 = arith.constant 0.899999976 : f32
    %31 = vector.broadcast %cst_16 : f32 to vector<1x64xf32>
    %32 = arith.mulf %31, %30 : vector<1x64xf32>
    %cst_17 = arith.constant 1.03225803 : f32
    %33 = vector.broadcast %cst_17 : f32 to vector<1x64xf32>
    %34 = arith.mulf %11, %33 : vector<1x64xf32>
    %cst_18 = arith.constant 1.000000e-01 : f32
    %35 = vector.broadcast %cst_18 : f32 to vector<1x64xf32>
    %36 = arith.mulf %35, %34 : vector<1x64xf32>
    %37 = arith.addf %32, %36 : vector<1x64xf32>
    %c1_19 = arith.constant 1 : index
    %c0_20 = arith.constant 0 : index
    %38 = vector.load %arg3[%c1_19, %c0_20] : memref<2x64xf32, #tpu.memory_space<vmem>>, vector<1x64xf32>
    tpu.vector_store %arg3[%c1_19, %c0_20], %37 {strides = array<i32>} : memref<2x64xf32, #tpu.memory_space<vmem>>, vector<1x64xf32>,
    return
  }
}

</mosaic_0001>

<bundles_post_ra>
// kernel: meta_batchnorm1d_forward.1
= control target key start
LH: loop header
LB: loop body
LE: loop exit
PB: predicated region body
PF: predicated region fallthrough
CT: control target
= control target key end

     0   :  { %9 = vsyncpa [#allocation3], 0  ;;  %s268_s0 = inlined_call_operand.hbm [shape: f32[32,64], index: 0, kind: input, shape index: {}]   ;;  %s269_s1 = inlined_call_operand.vmem [shape: f32[4,64], index: 1, kind: input, shape index: {}]   ;;  %s270_s2 = inlined_call_operand.hbm [shape: f32[32,64], index: 2, kind: output, shape index: {0}]   ;;  %s271_s3 = inlined_call_operand.vmem [shape: f32[2,64], index: 3, kind: output, shape index: {1}]  }
   0x1   :  { %10 = vsyncpa [#allocation4], 0  ;;  %s182_s12 = smov [#allocation2]   ;;  %s134_s16 = scalar_lea.hbm %s268_s0, 512 }
   0x2   :  { %s16_s13 = sshll.u32 %s182_s12, 4  ;;  %p135_p0 = scmp.ne.s32.totalorder %s268_s0, %s134_s16  ;;  %s17_s13 = int_to_ptr.vmem [resolvable:$true] %s16_s13 }
   0x3   :  { %p138_p1 = scmp.lt.u32.totalorder %s134_s16, %s268_s0 }
   0x5   :  { %p140_p2 = pnand %p138_p1, %p135_p0 }
   0x7   :  { %143 = shalt.err (!%p140_p2)
}
   0x8   :  { %s144_s21 = scalar_lea.vmem %s17_s13, 512  ;;  %p149_p4 = scmp.lt.s32.totalorder %s17_s13, %s17_s13 }
   0x9   :  { %p145_p3 = scmp.ne.s32.totalorder %s17_s13, %s144_s21  ;;  %p150_p5 = scmp.lt.s32.totalorder %s144_s21, %s144_s21 }
   0xb   :  { %p151_p6 = por %p150_p5, %p149_p4 }
   0xd   :  { %p152_p7 = pnand %p151_p6, %p145_p3 }
   0xf   :  { %155 = shalt.err (!%p152_p7)
}
  0x10   :  { %s183_s22 = smov 128   ;;  %s184_s23 = smov 8  }
  0x11   :  { %22 = dma.hbm_to_vmem [thread:$0]  %s268_s0, 512, %s17_s13, [#allocation3], %s183_s22, %s183_s22, %s184_s23  }
  0x12   :  { %178 = dma.done.wait [#allocation3], 512  }
  0x13   :  { %179 = vsyncadd [#allocation3], 4294966784  ;;  %vm32_vm0 = vcmask 523264   ;;  %v28_v0 = vld [vmem:[#allocation2] sm:$0xff]  ;;  %v29_v1 = vld [vmem:[#allocation2 + $0x8] sm:$0xff]  ;;  %vm98_vm1 = vcmask 516096   ;;  %v74_v49 = vlaneseq }
  0x14   :  { %v30_v2 = vld [vmem:[#allocation2 + $0x10] sm:$0xff]  ;;  %v31_v3 = vld [vmem:[#allocation2 + $0x18] sm:$0xff]  ;;  %v33_v4 = vsel %vm32_vm0, %v28_v0, 0.0  ;;  %v34_v5 = vsel %vm32_vm0, %v29_v1, 0.0  ;;  %v94_v17 = vld [vmem:[%s269_s1 + $0x2] sm:$0x1] }
  0x15   :  { %v36_v6 = vsel %vm32_vm0, %v30_v2, 0.0  ;;  %v35_v7 = vadd.f32 %v34_v5, %v33_v4  ;;  %v38_v8 = vsel %vm32_vm0, %v31_v3, 0.0  ;;  %v95_v19 = vmul.f32 0.9, %v94_v17  ;;  %v100_v43 = vld [vmem:[%s269_s1 + $0x3] sm:$0x1] }
  0x16   :  { %v101_v46 = vmul.f32 0.9, %v100_v43  ;;  %v75_v51 = vshrl.u32 %v74_v49, 7  ;;  %v69_v52 = vld [vmem:[%s269_s1] sm:$0x1]  ;;  %s185_s10 = smov [#allocation5]  }
  0x17   :  { %v37_v9 = vadd.f32 %v36_v6, %v35_v7  ;;  %v127_v57 = vld [vmem:[%s269_s1 + $0x1] ss:$0 sm:$0xff]  ;;  %s111_s11 = sshll.u32 %s185_s10, 4  ;;  %s112_s11 = int_to_ptr.vmem [resolvable:$true] %s111_s11 }
  0x18   :  { %v76_v53 = vsub.s32 0, %v75_v51  ;;  %s156_s1 = scalar_lea.vmem %s112_s11, 512  ;;  %p161_p9 = scmp.lt.s32.totalorder %s112_s11, %s112_s11 }
  0x19   :  { %v39_v10 = vadd.f32 %v38_v8, %v37_v9  ;;  %p157_p8 = scmp.ne.s32.totalorder %s112_s11, %s156_s1  ;;  %p162_p10 = scmp.lt.s32.totalorder %s156_s1, %s156_s1 }
  0x1b   :  { %v40_v11 = vrot.slane %v39_v10, 4  ;;  %p163_p11 = por %p162_p10, %p161_p9 }
  0x1d   :  { %v41_v12 = vadd.f32 %v40_v11, %v39_v10  ;;  %p164_p12 = pnand %p163_p11, %p157_p8 }
  0x1f   :  { %v42_v13 = vrot.slane %v41_v12, 2 }
  0x21   :  { %v43_v14 = vadd.f32 %v42_v13, %v41_v12 }
  0x23   :  { %v44_v15 = vrot.slane %v43_v14, 1 }
  0x25   :  { %v45_v16 = vadd.f32 %v44_v15, %v43_v14 }
  0x27   :  { %v46_v18 = vmul.f32 0.03125, %v45_v16 }
  0x29   :  { %v47_v20 = vsub.f32 %v28_v0, %v46_v18  ;;  %v48_v21 = vsub.f32 %v29_v1, %v46_v18  ;;  %v49_v22 = vsub.f32 %v30_v2, %v46_v18  ;;  %v50_v23 = vsub.f32 %v31_v3, %v46_v18 }
  0x2a   :  { %v96_v24 = vmul.f32 0.1, %v46_v18 }
  0x2b   :  { %v51_v25 = vmul.f32 %v47_v20, %v47_v20  ;;  %v52_v26 = vmul.f32 %v48_v21, %v48_v21  ;;  %v53_v27 = vmul.f32 %v49_v22, %v49_v22  ;;  %v54_v28 = vmul.f32 %v50_v23, %v50_v23 }
  0x2c   :  { %v97_v29 = vadd.f32 %v96_v24, %v95_v19 }
  0x2d   :  { %v55_v30 = vsel %vm32_vm0, %v51_v25, 0.0  ;;  %v56_v31 = vsel %vm32_vm0, %v52_v26, 0.0  ;;  %v58_v32 = vsel %vm32_vm0, %v53_v27, 0.0  ;;  %v60_v34 = vsel %vm32_vm0, %v54_v28, 0.0 }
  0x2e   :  { %v57_v33 = vadd.f32 %v56_v31, %v55_v30  ;;  %99 = vst.msk [vmem:[%s271_s3] sm:$0x1] %vm98_vm1, %v97_v29 }
  0x30   :  { %v59_v35 = vadd.f32 %v58_v32, %v57_v33 }
  0x32   :  { %v61_v36 = vadd.f32 %v60_v34, %v59_v35 }
  0x34   :  { %v62_v37 = vrot.slane %v61_v36, 4 }
  0x36   :  { %v63_v38 = vadd.f32 %v62_v37, %v61_v36 }
  0x38   :  { %v64_v39 = vrot.slane %v63_v38, 2 }
  0x3a   :  { %v65_v40 = vadd.f32 %v64_v39, %v63_v38 }
  0x3c   :  { %v66_v41 = vrot.slane %v65_v40, 1 }
  0x3e   :  { %v67_v42 = vadd.f32 %v66_v41, %v65_v40 }
  0x40   :  { %v68_v44 = vmul.f32 0.03125, %v67_v42 }
  0x42   :  { %v71_v45 = vadd.f32 1e-05, %v68_v44  ;;  %v102_v47 = vmul.f32 1.032258, %v68_v44 }
  0x44   :  { %132 = vrsqrt.f32 %v71_v45  ;;  %v103_v48 = vmul.f32 0.1, %v102_v47 }
  0x46   :  { %v104_v50 = vadd.f32 %v103_v48, %v101_v46 }
  0x48   :  { %105 = vst.msk [vmem:[%s271_s3 + $0x1] sm:$0x1] %vm98_vm1, %v104_v50 }
  0x4e   :  { %v133_v54 = vpop.eup %132 }
  0x4f   :  { %v73_v55 = vmul.f32 %v133_v54, %v69_v52 }
  0x51   :  { %v77_v56 = vrot.slane %v73_v55, %v76_v53 }
  0x53   :  { %v78_v58 = vmul.f32 %v77_v56, %v47_v20  ;;  %v79_v59 = vmul.f32 %v77_v56, %v48_v21  ;;  %v80_v60 = vmul.f32 %v77_v56, %v49_v22  ;;  %v81_v61 = vmul.f32 %v77_v56, %v50_v23 }
  0x55   :  { %v86_v62 = vadd.f32 %v127_v57, %v78_v58  ;;  %v87_v63 = vadd.f32 %v127_v57, %v79_v59  ;;  %v88_v0 = vadd.f32 %v127_v57, %v80_v60  ;;  %v89_v1 = vadd.f32 %v127_v57, %v81_v61 }
  0x57   :  { %90 = vst.msk [vmem:[#allocation5] sm:$0xff] %vm32_vm0, %v86_v62  ;;  %91 = vst.msk [vmem:[#allocation5 + $0x8] sm:$0xff] %vm32_vm0, %v87_v63 }
  0x58   :  { %92 = vst.msk [vmem:[#allocation5 + $0x10] sm:$0xff] %vm32_vm0, %v88_v0  ;;  %93 = vst.msk [vmem:[#allocation5 + $0x18] sm:$0xff] %vm32_vm0, %v89_v1 }
  0x59   :  { %167 = shalt.err (!%p164_p12)
}
  0x5a   :  { %s168_s13 = scalar_lea.hbm %s270_s2, 512 }
  0x5b   :  { %p169_p13 = scmp.ne.s32.totalorder %s270_s2, %s168_s13  ;;  %p172_p0 = scmp.lt.u32.totalorder %s168_s13, %s270_s2 }
  0x5d   :  { %p174_p1 = pnand %p172_p0, %p169_p13 }
  0x5f   :  { %177 = shalt.err (!%p174_p1)
}
  0x60   :  { %117 = dma.vmem_to_hbm [thread:$0]  %s112_s11, 512, %s270_s2, [#allocation4], %s183_s22, %s183_s22, %s184_s23  }
  0x61   :  { %180 = dma.done.wait [#allocation4], 512  }
  0x62   :  { %181 = vsyncadd [#allocation4], 4294966784 }
  0x63   :  { %125 = vsyncpa [#allocation3], 1 }
  0x64   :  { %126 = vsyncpa [#allocation4], 1 }

</bundles_post_ra>
